<compile_context>
chip_gen: v7x
topology: tpu7x:2x2x1
jax: 0.10.0
libtpu: 0.0.40
codegen_flags: <defaults>
</compile_context>

<pallas_src>
import jax
import jax.numpy as jnp
from jax.experimental import pallas as pl
from jax.experimental.pallas import tpu as pltpu


def _round_up(x, m):
    return ((x + m - 1) // m) * m


# Graphs per grid step cap: keeps per-step VMEM trivially small on every generation
# (v5e 16 MiB scoped default, v7x 64 MiB physical) while giving MXU-sized M rows.
_MAX_GRAPHS_PER_BLOCK = 256


def _make_fused_pair_mlp_kernel(num_layers, num_vertices, pair_idx, h1):
    """Fused pair-MLP kernel; one block of `gb` graphs per grid step.

    refs = (x_ref, w1_ref, b1_ref, [w2_ref, b2_ref, ...], o_ref)
      x_ref : (V, gb, feat)        bf16, vertex-major
      w1_ref: (feat, 2*h1)         bf16  ([W1a | W1b], acting on x[j] / x[i])
      b1_ref: (1, h1)              f32
      wl_ref: (size[l-1], size[l]) bf16,  bl_ref: (1, size[l]) f32
      o_ref : (gb, P*out_dim)      f32, graph-major, pairs flattened on lanes
    """

    def kernel(*refs):
        x_ref, w1_ref, b1_ref = refs[0], refs[1], refs[2]
        o_ref = refs[-1]
        rest = refs[3:-1]

        # Hoist all parameter loads out of the pair loop.
        w1 = w1_ref[...]                                   # (feat, 2*h1) bf16
        b1 = b1_ref[...]                                   # (1, h1) f32
        ws = [rest[2 * k][...] for k in range(num_layers - 1)]
        bs = [rest[2 * k + 1][...] for k in range(num_layers - 1)]

        # Layer-1 halves computed once per VERTEX (not per pair):
        #   y_v = x_v @ [W1a | W1b]  -> A_v = y_v[:, :h1],  B_v = y_v[:, h1:]
        halves = []
        for v in range(num_vertices):
            xv = x_ref[v]                                  # (gb, feat) bf16, static leading-axis load
            halves.append(jnp.dot(xv, w1, preferred_element_type=jnp.float32))  # (gb, 2*h1) f32

        # Per ordered pair (j < i):  h1[p] = A[j] + B[i] + b1  (no MXU, no gather).
        outs = []
        for (j, i) in pair_idx:
            h = halves[j][:, :h1] + halves[i][:, h1:] + b1          # (gb, h1) f32
            if num_layers > 1:
                h = jnp.maximum(h, 0.0)                             # F.relu after layer 1
            for l in range(num_layers - 1):
                h = jnp.dot(h.astype(ws[l].dtype), ws[l],
                            preferred_element_type=jnp.float32) + bs[l]
                if l != num_layers - 2:                             # no ReLU after last layer
                    h = jnp.maximum(h, 0.0)
            outs.append(h)                                          # (gb, out_dim) f32

        # Lane-concatenate the per-pair outputs -> one (gb, P*out_dim) store slab.
        o_ref[...] = jnp.concatenate(outs, axis=-1).astype(o_ref.dtype)

    return kernel


def make_mlp_pairs_fn(weights, biases, num_vertices):
    """Build a jitted forward function.

    Args:
      weights: PyTorch-layout Linear weights; weights[l] is (size[l+1], size[l]),
               weights[0] has size[0] == 2 * feat.
      biases:  list of (size[l+1],) biases.
      num_vertices: V.
    Returns:
      fwd(xb): (G, V, feat) -> (G, P, size[-1]); pair rows in the same (j, i)
      ordering as the PyTorch `prob` list (j < i, i is the outer loop).
    """
    num_layers = len(weights)
    two_feat = int(weights[0].shape[1])
    assert two_feat % 2 == 0, "size[0] must be 2*feat (concat of two vertex features)"
    feat = two_feat // 2
    h1 = int(weights[0].shape[0])
    out_dim = int(weights[-1].shape[0])

    pair_idx = [(j, i) for i in range(num_vertices) for j in range(i)]
    num_pairs = len(pair_idx)

    # --- one-time parameter preprocessing (cached; no per-call transposes/casts) ---
    w1 = jnp.asarray(weights[0], jnp.float32)                       # (h1, 2*feat), torch layout
    w1cat = jnp.concatenate([w1[:, :feat].T, w1[:, feat:].T],
                            axis=1).astype(jnp.bfloat16)            # (feat, 2*h1)
    b1 = jnp.asarray(biases[0], jnp.float32).reshape(1, -1)         # (1, h1)
    rest_params = []
    for w, b in zip(weights[1:], biases[1:]):
        rest_params.append(jnp.asarray(w, jnp.float32).T.astype(jnp.bfloat16))  # (in, out)
        rest_params.append(jnp.asarray(b, jnp.float32).reshape(1, -1))          # (1, out)

    kernel = _make_fused_pair_mlp_kernel(num_layers, num_vertices, pair_idx, h1)

    # Static per-graph FLOP count for the CostEstimate hint.
    flops_per_graph = 2 * num_vertices * feat * (2 * h1)            # per-vertex layer-1 dots
    in_d = h1
    for w in weights[1:]:
        flops_per_graph += 2 * num_pairs * in_d * int(w.shape[0])
        in_d = int(w.shape[0])
    param_bytes = (2 * int(w1cat.size) + 4 * int(b1.size)
                   + sum((2 if p.dtype == jnp.bfloat16 else 4) * int(p.size)
                         for p in rest_params))

    def _const_spec(arr):
        return pl.BlockSpec(arr.shape, lambda s, _n=arr.ndim: (0,) * _n)
    # TODO(synk): single-buffer the invariant params (pipeline_mode=pl.Buffered(1)) once
    # that path is exercised; with 1-4 grid steps the double-buffer cost is negligible.

    @jax.jit
    def fwd(xb):
        assert xb.ndim == 3 and xb.shape[1:] == (num_vertices, feat)
        num_graphs = int(xb.shape[0])

        # Graphs per block: one step for tiny batches (grid is a serial loop on v5e/v6e),
        # >= 2 balanced steps once there is enough work (both v7x TCs get macro-steps).
        if num_graphs >= 16:
            gb = min(_MAX_GRAPHS_PER_BLOCK, _round_up(pl.cdiv(num_graphs, 2), 8))
        else:
            gb = num_graphs
        g_pad = _round_up(num_graphs, gb)
        n_steps = g_pad // gb

        # Vertex-major bf16 input; layout munging/padding is cheap XLA plumbing.
        xt = jnp.transpose(xb, (1, 0, 2)).astype(jnp.bfloat16)      # (V, G, feat)
        if g_pad != num_graphs:
            xt = jnp.pad(xt, ((0, 0), (0, g_pad - num_graphs), (0, 0)))

        const_args = (w1cat, b1, *rest_params)
        in_specs = [pl.BlockSpec((num_vertices, gb, feat), lambda s: (0, s, 0))]
        in_specs += [_const_spec(a) for a in const_args]
        out_specs = pl.BlockSpec((gb, num_pairs * out_dim), lambda s: (s, 0))

        cost = pl.CostEstimate(
            flops=int(g_pad * flops_per_graph),
            transcendentals=0,
            bytes_accessed=int(2 * xt.size + param_bytes
                               + 4 * g_pad * num_pairs * out_dim),
        )

        out = pl.pallas_call(
            kernel,
            out_shape=jax.ShapeDtypeStruct((g_pad, num_pairs * out_dim), jnp.float32),
            grid=(n_steps,),
            in_specs=in_specs,
            out_specs=out_specs,
            compiler_params=pltpu.CompilerParams(
                dimension_semantics=("parallel",)),
            cost_estimate=cost,
        )(xt, *const_args)

        return out.reshape(g_pad, num_pairs, out_dim)[:num_graphs]

    return fwd


def _reference_forward(xb, weights, biases, num_vertices):
    """Plain-JAX f32 reference mirroring the PyTorch module (stacked output)."""
    pair_idx = [(j, i) for i in range(num_vertices) for j in range(i)]
    h = jnp.stack([jnp.concatenate([xb[:, j, :], xb[:, i, :]], axis=-1)
                   for (j, i) in pair_idx], axis=1)                 # (G, P, 2*feat)
    num_layers = len(weights)
    for l in range(num_layers):
        h = h @ weights[l].T + biases[l]
        if l != num_layers - 1:
            h = jnp.maximum(h, 0.0)
    return h


if __name__ == "__main__":
    # Module config (small, consistent with the predictor's __init__):
    num_vertices = 4
    feat = 16
    layers = 3
    size = [2 * feat, 64, 32, 8]      # size[0] must equal 2*feat

    key = jax.random.PRNGKey(0)

    # Deterministic parameter init (PyTorch Linear layout: W is (out, in)).
    weights, biases = [], []
    for l in range(1, layers + 1):
        key, wk, bk = jax.random.split(key, 3)
        weights.append(0.1 * jax.random.normal(wk, (size[l], size[l - 1]), jnp.float32))
        biases.append(0.1 * jax.random.normal(bk, (size[l],), jnp.float32))

    fwd = make_mlp_pairs_fn(weights, biases, num_vertices)

    # Small batch (single grid step) ...
    key, xk = jax.random.split(key)
    num_graphs = 3
    xb = jax.random.normal(xk, (num_graphs, num_vertices, feat), dtype=jnp.float32)
    out_b = fwd(xb)                    # (G, P, out_dim)
    out_single = fwd(xb[:1])[0]        # (P, out_dim)

    # ... and a larger batch exercising graph padding + the 2-step grid path.
    key, xk2 = jax.random.split(key)
    xb_big = jax.random.normal(xk2, (20, num_vertices, feat), dtype=jnp.float32)
    out_big = fwd(xb_big)

    jax.block_until_ready((out_b, out_single, out_big))

    # Check against the pure-JAX f32 reference of the PyTorch semantics.
    # (Tolerance relaxed because weights/activations are bf16 with f32 accumulation.)
    num_pairs = num_vertices * (num_vertices - 1) // 2
    ref_b = _reference_forward(xb, weights, biases, num_vertices)
    ref_big = _reference_forward(xb_big, weights, biases, num_vertices)

    assert out_b.shape == (num_graphs, num_pairs, size[-1])
    assert out_big.shape == (20, num_pairs, size[-1])
    assert jnp.allclose(out_b, ref_b, atol=5e-2, rtol=5e-2)
    assert jnp.allclose(out_single, ref_b[0], atol=5e-2, rtol=5e-2)
    assert jnp.allclose(out_big, ref_big, atol=5e-2, rtol=5e-2)
    # Callers needing the PyTorch-style python list can do `list(out[g])` outside
    # the hot path; the kernel itself returns the stacked array.

    print("KERNEL_OK")
</pallas_src>

<mosaic_0001>
module attributes {stable_mosaic.version = 11 : i64} {
  func.func @kernel(%arg0: i32, %arg1: memref<4x3x16xbf16, #tpu.memory_space<vmem>>, %arg2: memref<16x128xbf16, #tpu.memory_space<vmem>>, %arg3: memref<1x64xf32, #tpu.memory_space<vmem>>, %arg4: memref<64x32xbf16, #tpu.memory_space<vmem>>, %arg5: memref<1x32xf32, #tpu.memory_space<vmem>>, %arg6: memref<32x8xbf16, #tpu.memory_space<vmem>>, %arg7: memref<1x8xf32, #tpu.memory_space<vmem>>, %arg8: memref<3x48xf32, #tpu.memory_space<vmem>>) attributes {dimension_semantics = [#tpu.dimension_semantics<parallel>], iteration_bounds = array<i64: 1>, scalar_prefetch = 0 : i64, scratch_operands = 0 : i64, tpu.core_type = #tpu.core_type<tc>, window_params = [{transform_indices = @transform_0, window_bounds = array<i64: 4, 3, 16>}, {pipeline_mode = #tpu.pipeline_mode<synchronous>, transform_indices = @transform_1, window_bounds = array<i64: 16, 128>}, {pipeline_mode = #tpu.pipeline_mode<synchronous>, transform_indices = @transform_2, window_bounds = array<i64: 1, 64>}, {pipeline_mode = #tpu.pipeline_mode<synchronous>, transform_indices = @transform_3, window_bounds = array<i64: 64, 32>}, {pipeline_mode = #tpu.pipeline_mode<synchronous>, transform_indices = @transform_4, window_bounds = array<i64: 1, 32>}, {pipeline_mode = #tpu.pipeline_mode<synchronous>, transform_indices = @transform_5, window_bounds = array<i64: 32, 8>}, {pipeline_mode = #tpu.pipeline_mode<synchronous>, transform_indices = @transform_6, window_bounds = array<i64: 1, 8>}, {transform_indices = @transform_7, window_bounds = array<i64: 3, 48>}]} {
    %c0 = arith.constant 0 : index
    %c0_0 = arith.constant 0 : index
    %0 = vector.load %arg2[%c0, %c0_0] : memref<16x128xbf16, #tpu.memory_space<vmem>>, vector<16x128xbf16>
    %c0_1 = arith.constant 0 : index
    %c0_2 = arith.constant 0 : index
    %1 = vector.load %arg3[%c0_1, %c0_2] : memref<1x64xf32, #tpu.memory_space<vmem>>, vector<1x64xf32>
    %c0_3 = arith.constant 0 : index
    %c0_4 = arith.constant 0 : index
    %2 = vector.load %arg4[%c0_3, %c0_4] : memref<64x32xbf16, #tpu.memory_space<vmem>>, vector<64x32xbf16>
    %c0_5 = arith.constant 0 : index
    %c0_6 = arith.constant 0 : index
    %3 = vector.load %arg6[%c0_5, %c0_6] : memref<32x8xbf16, #tpu.memory_space<vmem>>, vector<32x8xbf16>
    %c0_7 = arith.constant 0 : index
    %c0_8 = arith.constant 0 : index
    %4 = vector.load %arg5[%c0_7, %c0_8] : memref<1x32xf32, #tpu.memory_space<vmem>>, vector<1x32xf32>
    %c0_9 = arith.constant 0 : index
    %c0_10 = arith.constant 0 : index
    %5 = vector.load %arg7[%c0_9, %c0_10] : memref<1x8xf32, #tpu.memory_space<vmem>>, vector<1x8xf32>
    %c0_11 = arith.constant 0 : index
    %c0_12 = arith.constant 0 : index
    %c0_13 = arith.constant 0 : index
    %6 = vector.load %arg1[%c0_11, %c0_12, %c0_13] : memref<4x3x16xbf16, #tpu.memory_space<vmem>>, vector<1x3x16xbf16>
    %7 = vector.shape_cast %6 : vector<1x3x16xbf16> to vector<3x16xbf16>
    %cst = arith.constant dense<0.000000e+00> : vector<3x128xf32>
    %8 = tpu.matmul %7, %0, %cst {dimension_numbers = #tpu.dot_dimension_numbers<[1], [0], [0], [1], [0, 0, 1, 1], [], []>} : vector<3x16xbf16>, vector<16x128xbf16>, vector<3x128xf32> -> vector<3x128xf32>
    %c1 = arith.constant 1 : index
    %c0_14 = arith.constant 0 : index
    %c0_15 = arith.constant 0 : index
    %9 = vector.load %arg1[%c1, %c0_14, %c0_15] : memref<4x3x16xbf16, #tpu.memory_space<vmem>>, vector<1x3x16xbf16>
    %10 = vector.shape_cast %9 : vector<1x3x16xbf16> to vector<3x16xbf16>
    %cst_16 = arith.constant dense<0.000000e+00> : vector<3x128xf32>
    %11 = tpu.matmul %10, %0, %cst_16 {dimension_numbers = #tpu.dot_dimension_numbers<[1], [0], [0], [1], [0, 0, 1, 1], [], []>} : vector<3x16xbf16>, vector<16x128xbf16>, vector<3x128xf32> -> vector<3x128xf32>
    %c2 = arith.constant 2 : index
    %c0_17 = arith.constant 0 : index
    %c0_18 = arith.constant 0 : index
    %12 = vector.load %arg1[%c2, %c0_17, %c0_18] : memref<4x3x16xbf16, #tpu.memory_space<vmem>>, vector<1x3x16xbf16>
    %13 = vector.shape_cast %12 : vector<1x3x16xbf16> to vector<3x16xbf16>
    %cst_19 = arith.constant dense<0.000000e+00> : vector<3x128xf32>
    %14 = tpu.matmul %13, %0, %cst_19 {dimension_numbers = #tpu.dot_dimension_numbers<[1], [0], [0], [1], [0, 0, 1, 1], [], []>} : vector<3x16xbf16>, vector<16x128xbf16>, vector<3x128xf32> -> vector<3x128xf32>
    %c3 = arith.constant 3 : index
    %c0_20 = arith.constant 0 : index
    %c0_21 = arith.constant 0 : index
    %15 = vector.load %arg1[%c3, %c0_20, %c0_21] : memref<4x3x16xbf16, #tpu.memory_space<vmem>>, vector<1x3x16xbf16>
    %16 = vector.shape_cast %15 : vector<1x3x16xbf16> to vector<3x16xbf16>
    %cst_22 = arith.constant dense<0.000000e+00> : vector<3x128xf32>
    %17 = tpu.matmul %16, %0, %cst_22 {dimension_numbers = #tpu.dot_dimension_numbers<[1], [0], [0], [1], [0, 0, 1, 1], [], []>} : vector<3x16xbf16>, vector<16x128xbf16>, vector<3x128xf32> -> vector<3x128xf32>
    %18 = vector.extract_strided_slice %8 {offsets = [0, 0], sizes = [3, 64], strides = [1, 1]} : vector<3x128xf32> to vector<3x64xf32>
    %19 = vector.extract_strided_slice %11 {offsets = [0, 64], sizes = [3, 64], strides = [1, 1]} : vector<3x128xf32> to vector<3x64xf32>
    %20 = arith.addf %18, %19 : vector<3x64xf32>
    %21 = vector.broadcast %1 : vector<1x64xf32> to vector<3x64xf32>
    %22 = arith.addf %20, %21 : vector<3x64xf32>
    %cst_23 = arith.constant 0.000000e+00 : f32
    %23 = vector.broadcast %cst_23 : f32 to vector<3x64xf32>
    %24 = arith.maximumf %22, %23 : vector<3x64xf32>
    %25 = arith.truncf %24 : vector<3x64xf32> to vector<3x64xbf16>
    %cst_24 = arith.constant dense<0.000000e+00> : vector<3x32xf32>
    %26 = tpu.matmul %25, %2, %cst_24 {dimension_numbers = #tpu.dot_dimension_numbers<[1], [0], [0], [1], [0, 0, 1, 1], [], []>} : vector<3x64xbf16>, vector<64x32xbf16>, vector<3x32xf32> -> vector<3x32xf32>
    %27 = vector.broadcast %4 : vector<1x32xf32> to vector<3x32xf32>
    %28 = arith.addf %26, %27 : vector<3x32xf32>
    %cst_25 = arith.constant 0.000000e+00 : f32
    %29 = vector.broadcast %cst_25 : f32 to vector<3x32xf32>
    %30 = arith.maximumf %28, %29 : vector<3x32xf32>
    %31 = arith.truncf %30 : vector<3x32xf32> to vector<3x32xbf16>
    %cst_26 = arith.constant dense<0.000000e+00> : vector<3x8xf32>
    %32 = tpu.matmul %31, %3, %cst_26 {dimension_numbers = #tpu.dot_dimension_numbers<[1], [0], [0], [1], [0, 0, 1, 1], [], []>} : vector<3x32xbf16>, vector<32x8xbf16>, vector<3x8xf32> -> vector<3x8xf32>
    %33 = vector.broadcast %5 : vector<1x8xf32> to vector<3x8xf32>
    %34 = arith.addf %32, %33 : vector<3x8xf32>
    %35 = vector.extract_strided_slice %8 {offsets = [0, 0], sizes = [3, 64], strides = [1, 1]} : vector<3x128xf32> to vector<3x64xf32>
    %36 = vector.extract_strided_slice %14 {offsets = [0, 64], sizes = [3, 64], strides = [1, 1]} : vector<3x128xf32> to vector<3x64xf32>
    %37 = arith.addf %35, %36 : vector<3x64xf32>
    %38 = vector.broadcast %1 : vector<1x64xf32> to vector<3x64xf32>
    %39 = arith.addf %37, %38 : vector<3x64xf32>
    %cst_27 = arith.constant 0.000000e+00 : f32
    %40 = vector.broadcast %cst_27 : f32 to vector<3x64xf32>
    %41 = arith.maximumf %39, %40 : vector<3x64xf32>
    %42 = arith.truncf %41 : vector<3x64xf32> to vector<3x64xbf16>
    %cst_28 = arith.constant dense<0.000000e+00> : vector<3x32xf32>
    %43 = tpu.matmul %42, %2, %cst_28 {dimension_numbers = #tpu.dot_dimension_numbers<[1], [0], [0], [1], [0, 0, 1, 1], [], []>} : vector<3x64xbf16>, vector<64x32xbf16>, vector<3x32xf32> -> vector<3x32xf32>
    %44 = vector.broadcast %4 : vector<1x32xf32> to vector<3x32xf32>
    %45 = arith.addf %43, %44 : vector<3x32xf32>
    %cst_29 = arith.constant 0.000000e+00 : f32
    %46 = vector.broadcast %cst_29 : f32 to vector<3x32xf32>
    %47 = arith.maximumf %45, %46 : vector<3x32xf32>
    %48 = arith.truncf %47 : vector<3x32xf32> to vector<3x32xbf16>
    %cst_30 = arith.constant dense<0.000000e+00> : vector<3x8xf32>
    %49 = tpu.matmul %48, %3, %cst_30 {dimension_numbers = #tpu.dot_dimension_numbers<[1], [0], [0], [1], [0, 0, 1, 1], [], []>} : vector<3x32xbf16>, vector<32x8xbf16>, vector<3x8xf32> -> vector<3x8xf32>
    %50 = vector.broadcast %5 : vector<1x8xf32> to vector<3x8xf32>
    %51 = arith.addf %49, %50 : vector<3x8xf32>
    %52 = vector.extract_strided_slice %11 {offsets = [0, 0], sizes = [3, 64], strides = [1, 1]} : vector<3x128xf32> to vector<3x64xf32>
    %53 = vector.extract_strided_slice %14 {offsets = [0, 64], sizes = [3, 64], strides = [1, 1]} : vector<3x128xf32> to vector<3x64xf32>
    %54 = arith.addf %52, %53 : vector<3x64xf32>
    %55 = vector.broadcast %1 : vector<1x64xf32> to vector<3x64xf32>
    %56 = arith.addf %54, %55 : vector<3x64xf32>
    %cst_31 = arith.constant 0.000000e+00 : f32
    %57 = vector.broadcast %cst_31 : f32 to vector<3x64xf32>
    %58 = arith.maximumf %56, %57 : vector<3x64xf32>
    %59 = arith.truncf %58 : vector<3x64xf32> to vector<3x64xbf16>
    %cst_32 = arith.constant dense<0.000000e+00> : vector<3x32xf32>
    %60 = tpu.matmul %59, %2, %cst_32 {dimension_numbers = #tpu.dot_dimension_numbers<[1], [0], [0], [1], [0, 0, 1, 1], [], []>} : vector<3x64xbf16>, vector<64x32xbf16>, vector<3x32xf32> -> vector<3x32xf32>
    %61 = vector.broadcast %4 : vector<1x32xf32> to vector<3x32xf32>
    %62 = arith.addf %60, %61 : vector<3x32xf32>
    %cst_33 = arith.constant 0.000000e+00 : f32
    %63 = vector.broadcast %cst_33 : f32 to vector<3x32xf32>
    %64 = arith.maximumf %62, %63 : vector<3x32xf32>
    %65 = arith.truncf %64 : vector<3x32xf32> to vector<3x32xbf16>
    %cst_34 = arith.constant dense<0.000000e+00> : vector<3x8xf32>
    %66 = tpu.matmul %65, %3, %cst_34 {dimension_numbers = #tpu.dot_dimension_numbers<[1], [0], [0], [1], [0, 0, 1, 1], [], []>} : vector<3x32xbf16>, vector<32x8xbf16>, vector<3x8xf32> -> vector<3x8xf32>
    %67 = vector.broadcast %5 : vector<1x8xf32> to vector<3x8xf32>
    %68 = arith.addf %66, %67 : vector<3x8xf32>
    %69 = vector.extract_strided_slice %8 {offsets = [0, 0], sizes = [3, 64], strides = [1, 1]} : vector<3x128xf32> to vector<3x64xf32>
    %70 = vector.extract_strided_slice %17 {offsets = [0, 64], sizes = [3, 64], strides = [1, 1]} : vector<3x128xf32> to vector<3x64xf32>
    %71 = arith.addf %69, %70 : vector<3x64xf32>
    %72 = vector.broadcast %1 : vector<1x64xf32> to vector<3x64xf32>
    %73 = arith.addf %71, %72 : vector<3x64xf32>
    %cst_35 = arith.constant 0.000000e+00 : f32
    %74 = vector.broadcast %cst_35 : f32 to vector<3x64xf32>
    %75 = arith.maximumf %73, %74 : vector<3x64xf32>
    %76 = arith.truncf %75 : vector<3x64xf32> to vector<3x64xbf16>
    %cst_36 = arith.constant dense<0.000000e+00> : vector<3x32xf32>
    %77 = tpu.matmul %76, %2, %cst_36 {dimension_numbers = #tpu.dot_dimension_numbers<[1], [0], [0], [1], [0, 0, 1, 1], [], []>} : vector<3x64xbf16>, vector<64x32xbf16>, vector<3x32xf32> -> vector<3x32xf32>
    %78 = vector.broadcast %4 : vector<1x32xf32> to vector<3x32xf32>
    %79 = arith.addf %77, %78 : vector<3x32xf32>
    %cst_37 = arith.constant 0.000000e+00 : f32
    %80 = vector.broadcast %cst_37 : f32 to vector<3x32xf32>
    %81 = arith.maximumf %79, %80 : vector<3x32xf32>
    %82 = arith.truncf %81 : vector<3x32xf32> to vector<3x32xbf16>
    %cst_38 = arith.constant dense<0.000000e+00> : vector<3x8xf32>
    %83 = tpu.matmul %82, %3, %cst_38 {dimension_numbers = #tpu.dot_dimension_numbers<[1], [0], [0], [1], [0, 0, 1, 1], [], []>} : vector<3x32xbf16>, vector<32x8xbf16>, vector<3x8xf32> -> vector<3x8xf32>
    %84 = vector.broadcast %5 : vector<1x8xf32> to vector<3x8xf32>
    %85 = arith.addf %83, %84 : vector<3x8xf32>
    %86 = vector.extract_strided_slice %11 {offsets = [0, 0], sizes = [3, 64], strides = [1, 1]} : vector<3x128xf32> to vector<3x64xf32>
    %87 = vector.extract_strided_slice %17 {offsets = [0, 64], sizes = [3, 64], strides = [1, 1]} : vector<3x128xf32> to vector<3x64xf32>
    %88 = arith.addf %86, %87 : vector<3x64xf32>
    %89 = vector.broadcast %1 : vector<1x64xf32> to vector<3x64xf32>
    %90 = arith.addf %88, %89 : vector<3x64xf32>
    %cst_39 = arith.constant 0.000000e+00 : f32
    %91 = vector.broadcast %cst_39 : f32 to vector<3x64xf32>
    %92 = arith.maximumf %90, %91 : vector<3x64xf32>
    %93 = arith.truncf %92 : vector<3x64xf32> to vector<3x64xbf16>
    %cst_40 = arith.constant dense<0.000000e+00> : vector<3x32xf32>
    %94 = tpu.matmul %93, %2, %cst_40 {dimension_numbers = #tpu.dot_dimension_numbers<[1], [0], [0], [1], [0, 0, 1, 1], [], []>} : vector<3x64xbf16>, vector<64x32xbf16>, vector<3x32xf32> -> vector<3x32xf32>
    %95 = vector.broadcast %4 : vector<1x32xf32> to vector<3x32xf32>
    %96 = arith.addf %94, %95 : vector<3x32xf32>
    %cst_41 = arith.constant 0.000000e+00 : f32
    %97 = vector.broadcast %cst_41 : f32 to vector<3x32xf32>
    %98 = arith.maximumf %96, %97 : vector<3x32xf32>
    %99 = arith.truncf %98 : vector<3x32xf32> to vector<3x32xbf16>
    %cst_42 = arith.constant dense<0.000000e+00> : vector<3x8xf32>
    %100 = tpu.matmul %99, %3, %cst_42 {dimension_numbers = #tpu.dot_dimension_numbers<[1], [0], [0], [1], [0, 0, 1, 1], [], []>} : vector<3x32xbf16>, vector<32x8xbf16>, vector<3x8xf32> -> vector<3x8xf32>
    %101 = vector.broadcast %5 : vector<1x8xf32> to vector<3x8xf32>
    %102 = arith.addf %100, %101 : vector<3x8xf32>
    %103 = vector.extract_strided_slice %14 {offsets = [0, 0], sizes = [3, 64], strides = [1, 1]} : vector<3x128xf32> to vector<3x64xf32>
    %104 = vector.extract_strided_slice %17 {offsets = [0, 64], sizes = [3, 64], strides = [1, 1]} : vector<3x128xf32> to vector<3x64xf32>
    %105 = arith.addf %103, %104 : vector<3x64xf32>
    %106 = vector.broadcast %1 : vector<1x64xf32> to vector<3x64xf32>
    %107 = arith.addf %105, %106 : vector<3x64xf32>
    %cst_43 = arith.constant 0.000000e+00 : f32
    %108 = vector.broadcast %cst_43 : f32 to vector<3x64xf32>
    %109 = arith.maximumf %107, %108 : vector<3x64xf32>
    %110 = arith.truncf %109 : vector<3x64xf32> to vector<3x64xbf16>
    %cst_44 = arith.constant dense<0.000000e+00> : vector<3x32xf32>
    %111 = tpu.matmul %110, %2, %cst_44 {dimension_numbers = #tpu.dot_dimension_numbers<[1], [0], [0], [1], [0, 0, 1, 1], [], []>} : vector<3x64xbf16>, vector<64x32xbf16>, vector<3x32xf32> -> vector<3x32xf32>
    %112 = vector.broadcast %4 : vector<1x32xf32> to vector<3x32xf32>
    %113 = arith.addf %111, %112 : vector<3x32xf32>
    %cst_45 = arith.constant 0.000000e+00 : f32
    %114 = vector.broadcast %cst_45 : f32 to vector<3x32xf32>
    %115 = arith.maximumf %113, %114 : vector<3x32xf32>
    %116 = arith.truncf %115 : vector<3x32xf32> to vector<3x32xbf16>
    %cst_46 = arith.constant dense<0.000000e+00> : vector<3x8xf32>
    %117 = tpu.matmul %116, %3, %cst_46 {dimension_numbers = #tpu.dot_dimension_numbers<[1], [0], [0], [1], [0, 0, 1, 1], [], []>} : vector<3x32xbf16>, vector<32x8xbf16>, vector<3x8xf32> -> vector<3x8xf32>
    %118 = vector.broadcast %5 : vector<1x8xf32> to vector<3x8xf32>
    %119 = arith.addf %117, %118 : vector<3x8xf32>
    %120 = tpu.concatenate %34, %51, %68, %85, %102, %119 in 1 : vector<3x8xf32>, vector<3x8xf32>, vector<3x8xf32>, vector<3x8xf32>, vector<3x8xf32>, vector<3x8xf32> -> vector<3x48xf32>
    %c0_47 = arith.constant 0 : index
    %c0_48 = arith.constant 0 : index
    %121 = vector.load %arg8[%c0_47, %c0_48] : memref<3x48xf32, #tpu.memory_space<vmem>>, vector<3x48xf32>
    tpu.vector_store %arg8[%c0_47, %c0_48], %120 {strides = array<i32>} : memref<3x48xf32, #tpu.memory_space<vmem>>, vector<3x48xf32>,
    return
  }
  func.func @transform_0(%arg0: i32) -> (i32, i32, i32) {
    %c0_i32 = arith.constant 0 : i32
    %c0_i32_0 = arith.constant 0 : i32
    %c0_i32_1 = arith.constant 0 : i32
    return %c0_i32, %arg0, %c0_i32_0 : i32, i32, i32
  }
  func.func @transform_1(%arg0: i32) -> (i32, i32) {
    %c0_i32 = arith.constant 0 : i32
    %c0_i32_0 = arith.constant 0 : i32
    %c0_i32_1 = arith.constant 0 : i32
    return %c0_i32, %c0_i32_0 : i32, i32
  }
  func.func @transform_2(%arg0: i32) -> (i32, i32) {
    %c0_i32 = arith.constant 0 : i32
    %c0_i32_0 = arith.constant 0 : i32
    %c0_i32_1 = arith.constant 0 : i32
    return %c0_i32, %c0_i32_0 : i32, i32
  }
  func.func @transform_3(%arg0: i32) -> (i32, i32) {
    %c0_i32 = arith.constant 0 : i32
    %c0_i32_0 = arith.constant 0 : i32
    %c0_i32_1 = arith.constant 0 : i32
    return %c0_i32, %c0_i32_0 : i32, i32
  }
  func.func @transform_4(%arg0: i32) -> (i32, i32) {
    %c0_i32 = arith.constant 0 : i32
    %c0_i32_0 = arith.constant 0 : i32
    %c0_i32_1 = arith.constant 0 : i32
    return %c0_i32, %c0_i32_0 : i32, i32
  }
  func.func @transform_5(%arg0: i32) -> (i32, i32) {
    %c0_i32 = arith.constant 0 : i32
    %c0_i32_0 = arith.constant 0 : i32
    %c0_i32_1 = arith.constant 0 : i32
    return %c0_i32, %c0_i32_0 : i32, i32
  }
  func.func @transform_6(%arg0: i32) -> (i32, i32) {
    %c0_i32 = arith.constant 0 : i32
    %c0_i32_0 = arith.constant 0 : i32
    %c0_i32_1 = arith.constant 0 : i32
    return %c0_i32, %c0_i32_0 : i32, i32
  }
  func.func @transform_7(%arg0: i32) -> (i32, i32) {
    %c0_i32 = arith.constant 0 : i32
    %c0_i32_0 = arith.constant 0 : i32
    return %arg0, %c0_i32 : i32, i32
  }
}

</mosaic_0001>

<bundles_post_ra>
// kernel: fwd.1
= control target key start
LH: loop header
LB: loop body
LE: loop exit
PB: predicated region body
PF: predicated region fallthrough
CT: control target
= control target key end

     0   :  { %v1128_v0 = vmov 0.0   ;;  %vm1129_vm0 = vmmov 0   ;;  %vm51_vm1 = vcmask 130048   ;;  %s1130_s17 = smov 64   ;;  %vm274_vm2 = vcmask 523264   ;;  %s1131_s24 = smov 8   ;;  %s1387_s1 = inlined_call_operand.vmem [shape: bf16[16,128], index: 1, kind: input, shape index: {}]   ;;  %s1388_s0 = inlined_call_operand.vmem [shape: bf16[4,3,16], index: 0, kind: input, shape index: {}]   ;;  %s1389_s3 = inlined_call_operand.vmem [shape: bf16[64,32], index: 3, kind: input, shape index: {}]   ;;  %s1390_s5 = inlined_call_operand.vmem [shape: bf16[32,8], index: 5, kind: input, shape index: {}]   ;;  %s1391_s2 = inlined_call_operand.vmem [shape: f32[1,64], index: 2, kind: input, shape index: {}]   ;;  %s1392_s4 = inlined_call_operand.vmem [shape: f32[1,32], index: 4, kind: input, shape index: {}]   ;;  %s1393_s6 = inlined_call_operand.vmem [shape: f32[1,8], index: 6, kind: input, shape index: {}]   ;;  %s1394_s7 = inlined_call_operand.vmem [shape: f32[3,48], index: 7, kind: output, shape index: {}]  }
   0x1   :  { %969 = vmatprep.subr.bf16.mxu0 %v1128_v0  ;;  %975 = vmatprep.subr.bf16.mxu1 %v1128_v0  ;;  %v1121_v1 = vld [vmem:[%s1387_s1] sm:$0xff]   ;;  %v1222_v7 = vld [vmem:[%s1389_s3 + $0x8] sm:$0xff]   ;;  %v1230_v8 = vld [vmem:[%s1389_s3 + $0x10] sm:$0xff]   ;;  %vm338_vm3 = vcmask 261120   ;;  %s1133_s25 = smov 24   ;;  %s1134_s26 = smov 32  }
   0x2   :  { %971 = vmatprep.mubr.msk.bf16.mxu0 %vm1129_vm0, %v1128_v0  ;;  %977 = vmatprep.mubr.msk.bf16.mxu1 %vm1129_vm0, %v1128_v0  ;;  %v44_v2 = vld [vmem:[%s1388_s0] sm:$0x3]  ;;  %v886_v3 = vld [vmem:[%s1388_s0 + $0x2] sm:$0x3]  ;;  %v888_v4 = vld [vmem:[%s1388_s0 + $0x4] sm:$0x3] }
   0x3   :  { %970 = vmatpush3.bf16.msra.mxu0 %v1121_v1  ;;  %976 = vmatpush3.bf16.msra.mxu1 %v1121_v1  ;;  %v890_v5 = vld [vmem:[%s1388_s0 + $0x6] sm:$0x3]  ;;  %v1237_v9 = vld [vmem:[%s1389_s3 + $0x18] sm:$0xff]   ;;  %v892_v27 = vld [vmem:[%s1391_s2] ss:$0 sm:$0xff]  ;;  %s1135_s27 = smov 40  }
   0x4   :  { %981 = vmatprep.subr.bf16.mxu0 %v1128_v0  ;;  %987 = vmatprep.subr.bf16.mxu1 %v1128_v0  ;;  %v1216_v6 = vld [vmem:[%s1389_s3] sm:$0xff]   ;;  %v1265_v45 = vld [vmem:[%s1390_s5 + $0x8] sm:$0xff]   ;;  %vm870_vm4 = vcmask 64512   ;;  %vm873_vm5 = vcmask 195584   ;;  %vm876_vm6 = vcmask 326656   ;;  %vm878_vm7 = vcmask 387072  }
   0x5   :  { %v1244_v18 = vld [vmem:[%s1390_s5] sm:$0xff]  }
   0x6   :  { %972 = vmatmul.mubr.msk.bf16.vlgmr.msra.gmra.mrb[0].mxu0 %vm51_vm1, %v44_v2  ;;  %978 = vmatmul.mubr.msk.bf16.vlgmr.msra.gmra.mrb[0].mxu1 %vm51_vm1, %v886_v3  ;;  %v1274_v46 = vld [vmem:[%s1392_s4] ss:$0 sm:$0xff] }
   0x7   :  { %982 = vmatpush3.bf16.msra.mxu0 %v1121_v1  ;;  %988 = vmatpush3.bf16.msra.mxu1 %v1121_v1 }
   0x8   :  { %983 = vmatprep.mubr.msk.bf16.mxu0 %vm1129_vm0, %v1128_v0  ;;  %989 = vmatprep.mubr.msk.bf16.mxu1 %vm1129_vm0, %v1128_v0 }
   0x9   :  { %993 = vmatprep.subr.bf16.mxu0 %v1128_v0  ;;  %1005 = vmatprep.subr.bf16.mxu1 %v1128_v0 }
   0xe   :  { %984 = vmatmul.mubr.msk.bf16.vlgmr.msra.gmra.mrb[4].mxu0 %vm51_vm1, %v888_v4  ;;  %990 = vmatmul.mubr.msk.bf16.vlgmr.msra.gmra.mrb[4].mxu1 %vm51_vm1, %v890_v5 }
   0xf   :  { %1001 = vmatprep.mubr.msk.bf16.mxu0 %vm1129_vm0, %v1128_v0  ;;  %1009 = vmatprep.mubr.msk.bf16.mxu1 %vm1129_vm0, %v1128_v0 }
  0x10   :  { %994 = vmatpush3.bf16.msra.mxu0 %v1216_v6  ;;  %1006 = vmatpush3.bf16.msra.mxu1 %v1244_v18 }
  0x11   :  { %995 = vmatprep.subr.bf16.mxu0 %v1128_v0  ;;  %1007 = vmatprep.subr.bf16.mxu1 %v1128_v0 }
  0x14   :  { %996 = vmatpush3.bf16.msra.mxu0 %v1222_v7  ;;  %1008 = vmatpush3.bf16.msra.mxu1 %v1265_v45 }
  0x15   :  { %997 = vmatprep.subr.bf16.mxu0 %v1128_v0  ;;  %1013 = vmatprep.subr.bf16.mxu1 %v1128_v0 }
  0x18   :  { %998 = vmatpush3.bf16.msra.mxu0 %v1230_v8 }
  0x19   :  { %999 = vmatprep.subr.bf16.mxu0 %v1128_v0 }
  0x1c   :  { %1000 = vmatpush3.bf16.msra.mxu0 %v1237_v9 }
  0x1d   :  { %1025 = vmatprep.subr.bf16.mxu0 %v1128_v0 }
  0xd9   :  { %v134_v10 = vpop.f32.mrb[0].mxu1  ;;  %v89_v11 = vpop.f32.mrb[0].mxu0 }
  0xda   :  { %231 = vrot.lane.b32.xlu0 %v134_v10, %s1130_s17  ;;  %v979_v12 = vpop.f32.mrb[1].mxu1  ;;  %v973_v13 = vpop.f32.mrb[1].mxu0 }
  0xdb   :  { %v137_v14 = vpop.f32.mrb[2].mxu1  ;;  %v92_v15 = vpop.f32.mrb[2].mxu0 }
  0xdc   :  { %v980_v16 = vpop.f32.mrb[3].mxu1  ;;  %v974_v17 = vpop.f32.mrb[3].mxu0 }
  0xe1   :  { %v179_v19 = vpop.f32.mrb[4].mxu0  ;;  %v224_v20 = vpop.f32.mrb[4].mxu1 }
  0xe2   :  { %571 = vrot.lane.b32.xlu1 %v224_v20, %s1130_s17  ;;  %383 = vrot.lane.b32.xlu0 %v179_v19, %s1130_s17  ;;  %v985_v21 = vpop.f32.mrb[5].mxu0  ;;  %v991_v22 = vpop.f32.mrb[5].mxu1 }
  0xe3   :  { %v182_v23 = vpop.f32.mrb[6].mxu0  ;;  %v227_v24 = vpop.f32.mrb[6].mxu1 }
  0xe4   :  { %v986_v25 = vpop.f32.mrb[7].mxu0  ;;  %v992_v26 = vpop.f32.mrb[7].mxu1 }
 0x14c   :  { %v232_v28 = vpop.permute.xlu0 %231 }
 0x14d   :  { %v234_v29 = vadd.f32 %v232_v28, %v89_v11 }
 0x14f   :  { %v241_v30 = vadd.f32 %v892_v27, %v234_v29 }
 0x151   :  { %v242_v31 = vmax.f32 %v241_v30, 0.0 }
 0x153   :  { %v243_v32 = vpack.c.bf16 %v242_v31, %v242_v31 }
 0x154   :  { %v572_v33 = vpop.permute.xlu1 %571  ;;  %v384_v34 = vpop.permute.xlu0 %383 }
 0x155   :  { %v574_v35 = vadd.f32 %v572_v33, %v89_v11  ;;  %v666_v36 = vadd.f32 %v572_v33, %v134_v10  ;;  %v758_v37 = vadd.f32 %v572_v33, %v179_v19  ;;  %v386_v38 = vadd.f32 %v384_v34, %v89_v11  ;;  %1002 = vmatmul.mubr.msk.bf16.vlgmr.msra.gmra.mrb[8].mxu0 %vm274_vm2, %v243_v32 }
 0x156   :  { %v478_v39 = vadd.f32 %v384_v34, %v134_v10  ;;  %1026 = vmatpush3.bf16.msra.mxu0 %v1244_v18  ;;  %1029 = vmatprep.mubr.msk.bf16.mxu0 %vm1129_vm0, %v1128_v0  ;;  %v1319_v10 = vld [vmem:[%s1393_s6] ss:$0 sm:$0xff]  ;;  %s1132_s6 = smov 16  }
 0x157   :  { %v1255_v40 = vadd.f32 %v892_v27, %v574_v35  ;;  %v1257_v41 = vadd.f32 %v892_v27, %v666_v36  ;;  %v1259_v42 = vadd.f32 %v892_v27, %v758_v37  ;;  %v387_v43 = vadd.f32 %v892_v27, %v386_v38  ;;  %1027 = vmatprep.subr.bf16.mxu0 %v1128_v0 }
 0x158   :  { %v479_v44 = vadd.f32 %v892_v27, %v478_v39 }
 0x159   :  { %v388_v54 = vmax.f32 %v387_v43, 0.0  ;;  %v576_v24 = vmax.f32 %v1255_v40, 0.0  ;;  %v668_v38 = vmax.f32 %v1257_v41, 0.0 }
 0x15a   :  { %1028 = vmatpush3.bf16.msra.mxu0 %v1265_v45  ;;  %v480_v4 = vmax.f32 %v479_v44, 0.0 }
 0x15b   :  { %1033 = vmatprep.subr.bf16.mxu0 %v1128_v0  ;;  %v389_v55 = vpack.c.bf16 %v388_v54, %v388_v54  ;;  %v577_v25 = vpack.c.bf16 %v576_v24, %v576_v24  ;;  %v669_v39 = vpack.c.bf16 %v668_v38, %v668_v38 }
 0x15c   :  { %v481_v5 = vpack.c.bf16 %v480_v4, %v480_v4 }
 0x228   :  { %v312_v47 = vpop.f32.mrb[8].mxu0 }
 0x229   :  { %v313_v48 = vadd.f32 %v1274_v46, %v312_v47  ;;  %v1003_v49 = vpop.f32.mrb[9].mxu0 }
 0x22a   :  { %v315_v50 = vpop.f32.mrb[10].mxu0 }
 0x22b   :  { %v318_v51 = vmax.f32 %v313_v48, 0.0  ;;  %v1004_v52 = vpop.f32.mrb[11].mxu0 }
 0x22d   :  { %v319_v53 = vpack.c.bf16 %v318_v51, %v318_v51 }
 0x22f   :  { %1010 = vmatmul.mubr.msk.bf16.vlgmr.msra.gmra.mrb[8].mxu1 %vm338_vm3, %v319_v53 }
 0x230   :  { %1014 = vmatpush3.bf16.msra.mxu1 %v1216_v6  ;;  %1021 = vmatprep.mubr.msk.bf16.mxu1 %vm1129_vm0, %v1128_v0 }
 0x231   :  { %1015 = vmatprep.subr.bf16.mxu1 %v1128_v0 }
 0x234   :  { %1016 = vmatpush3.bf16.msra.mxu1 %v1222_v7 }
 0x235   :  { %1017 = vmatprep.subr.bf16.mxu1 %v1128_v0 }
 0x238   :  { %1018 = vmatpush3.bf16.msra.mxu1 %v1230_v8 }
 0x239   :  { %1019 = vmatprep.subr.bf16.mxu1 %v1128_v0 }
 0x23c   :  { %1020 = vmatpush3.bf16.msra.mxu1 %v1237_v9 }
 0x23d   :  { %1045 = vmatprep.subr.bf16.mxu1 %v1128_v0 }
 0x23f   :  { %1022 = vmatmul.mubr.msk.bf16.vlgmr.msra.gmra.mrb[12].mxu1 %vm274_vm2, %v389_v55 }
 0x240   :  { %1046 = vmatpush3.bf16.msra.mxu1 %v1244_v18  ;;  %1049 = vmatprep.mubr.msk.bf16.mxu1 %vm1129_vm0, %v1128_v0 }
 0x241   :  { %1047 = vmatprep.subr.bf16.mxu1 %v1128_v0 }
 0x244   :  { %1048 = vmatpush3.bf16.msra.mxu1 %v1265_v45 }
 0x245   :  { %1053 = vmatprep.subr.bf16.mxu1 %v1128_v0 }
 0x302   :  { %v1295_v56 = vpop.f32.mrb[8].mxu1 }
 0x303   :  { %v1011_v57 = vpop.f32.mrb[9].mxu1 }
 0x304   :  { %v379_v58 = vpop.f32.mrb[10].mxu1 }
 0x305   :  { %v1012_v59 = vpop.f32.mrb[11].mxu1 }
 0x312   :  { %v427_v60 = vpop.f32.mrb[12].mxu1 }
 0x313   :  { %v428_v61 = vadd.f32 %v1274_v46, %v427_v60  ;;  %v1023_v62 = vpop.f32.mrb[13].mxu1 }
 0x314   :  { %v430_v63 = vpop.f32.mrb[14].mxu1 }
 0x315   :  { %v433_v1 = vmax.f32 %v428_v61, 0.0  ;;  %v1024_v2 = vpop.f32.mrb[15].mxu1 }
 0x317   :  { %v434_v3 = vpack.c.bf16 %v433_v1, %v433_v1 }
 0x319   :  { %1030 = vmatmul.mubr.msk.bf16.vlgmr.msra.gmra.mrb[12].mxu0 %vm338_vm3, %v434_v3 }
 0x31a   :  { %1034 = vmatpush3.bf16.msra.mxu0 %v1216_v6  ;;  %1041 = vmatprep.mubr.msk.bf16.mxu0 %vm1129_vm0, %v1128_v0 }
 0x31b   :  { %1035 = vmatprep.subr.bf16.mxu0 %v1128_v0 }
 0x31e   :  { %1036 = vmatpush3.bf16.msra.mxu0 %v1222_v7 }
 0x31f   :  { %1037 = vmatprep.subr.bf16.mxu0 %v1128_v0 }
 0x322   :  { %1038 = vmatpush3.bf16.msra.mxu0 %v1230_v8 }
 0x323   :  { %1039 = vmatprep.subr.bf16.mxu0 %v1128_v0 }
 0x326   :  { %1040 = vmatpush3.bf16.msra.mxu0 %v1237_v9 }
 0x327   :  { %1065 = vmatprep.subr.bf16.mxu0 %v1128_v0 }
 0x329   :  { %1042 = vmatmul.mubr.msk.bf16.vlgmr.msra.gmra.mrb[16].mxu0 %vm274_vm2, %v481_v5 }
 0x32a   :  { %1066 = vmatpush3.bf16.msra.mxu0 %v1244_v18  ;;  %1069 = vmatprep.mubr.msk.bf16.mxu0 %vm1129_vm0, %v1128_v0 }
 0x32b   :  { %1067 = vmatprep.subr.bf16.mxu0 %v1128_v0 }
 0x32e   :  { %1068 = vmatpush3.bf16.msra.mxu0 %v1265_v45 }
 0x32f   :  { %1073 = vmatprep.subr.bf16.mxu0 %v1128_v0 }
 0x3ec   :  { %v472_v11 = vpop.f32.mrb[12].mxu0 }
 0x3ed   :  { %v473_v12 = vadd.f32 %v1319_v10, %v472_v11  ;;  %v1031_v13 = vpop.f32.mrb[13].mxu0 }
 0x3ee   :  { %v475_v14 = vpop.f32.mrb[14].mxu0 }
 0x3ef   :  { %851 = vrot.lane.b32.xlu1 %v473_v12, %s1131_s24  ;;  %v1032_v15 = vpop.f32.mrb[15].mxu0 }
 0x3fc   :  { %v519_v16 = vpop.f32.mrb[16].mxu0 }
 0x3fd   :  { %v520_v17 = vadd.f32 %v1274_v46, %v519_v16  ;;  %v1043_v19 = vpop.f32.mrb[17].mxu0 }
 0x3fe   :  { %v522_v20 = vpop.f32.mrb[18].mxu0 }
 0x3ff   :  { %v525_v21 = vmax.f32 %v520_v17, 0.0  ;;  %v1044_v22 = vpop.f32.mrb[19].mxu0 }
 0x401   :  { %v526_v23 = vpack.c.bf16 %v525_v21, %v525_v21 }
 0x403   :  { %1050 = vmatmul.mubr.msk.bf16.vlgmr.msra.gmra.mrb[16].mxu1 %vm338_vm3, %v526_v23 }
 0x404   :  { %1054 = vmatpush3.bf16.msra.mxu1 %v1216_v6  ;;  %1061 = vmatprep.mubr.msk.bf16.mxu1 %vm1129_vm0, %v1128_v0 }
 0x405   :  { %1055 = vmatprep.subr.bf16.mxu1 %v1128_v0 }
 0x408   :  { %1056 = vmatpush3.bf16.msra.mxu1 %v1222_v7 }
 0x409   :  { %1057 = vmatprep.subr.bf16.mxu1 %v1128_v0 }
 0x40c   :  { %1058 = vmatpush3.bf16.msra.mxu1 %v1230_v8 }
 0x40d   :  { %1059 = vmatprep.subr.bf16.mxu1 %v1128_v0 }
 0x410   :  { %1060 = vmatpush3.bf16.msra.mxu1 %v1237_v9 }
 0x411   :  { %1085 = vmatprep.subr.bf16.mxu1 %v1128_v0 }
 0x413   :  { %1062 = vmatmul.mubr.msk.bf16.vlgmr.msra.gmra.mrb[20].mxu1 %vm274_vm2, %v577_v25 }
 0x414   :  { %1086 = vmatpush3.bf16.msra.mxu1 %v1244_v18  ;;  %1089 = vmatprep.mubr.msk.bf16.mxu1 %vm1129_vm0, %v1128_v0 }
 0x415   :  { %1087 = vmatprep.subr.bf16.mxu1 %v1128_v0 }
 0x418   :  { %1088 = vmatpush3.bf16.msra.mxu1 %v1265_v45 }
 0x419   :  { %1093 = vmatprep.subr.bf16.mxu1 %v1128_v0 }
 0x461   :  { %v852_v4 = vpop.permute.xlu1 %851 }
 0x4d6   :  { %v564_v26 = vpop.f32.mrb[16].mxu1 }
 0x4d7   :  { %v565_v27 = vadd.f32 %v1319_v10, %v564_v26  ;;  %v1051_v28 = vpop.f32.mrb[17].mxu1 }
 0x4d8   :  { %v567_v29 = vpop.f32.mrb[18].mxu1 }
 0x4d9   :  { %855 = vrot.lane.b32.xlu0 %v565_v27, %s1132_s6  ;;  %v1052_v30 = vpop.f32.mrb[19].mxu1 }
 0x4e6   :  { %v615_v31 = vpop.f32.mrb[20].mxu1 }
 0x4e7   :  { %v616_v32 = vadd.f32 %v1274_v46, %v615_v31  ;;  %v1063_v33 = vpop.f32.mrb[21].mxu1 }
 0x4e8   :  { %v618_v34 = vpop.f32.mrb[22].mxu1 }
 0x4e9   :  { %v621_v35 = vmax.f32 %v616_v32, 0.0  ;;  %v1064_v36 = vpop.f32.mrb[23].mxu1 }
 0x4eb   :  { %v622_v37 = vpack.c.bf16 %v621_v35, %v621_v35 }
 0x4ed   :  { %1070 = vmatmul.mubr.msk.bf16.vlgmr.msra.gmra.mrb[20].mxu0 %vm338_vm3, %v622_v37 }
 0x4ee   :  { %1074 = vmatpush3.bf16.msra.mxu0 %v1216_v6  ;;  %1081 = vmatprep.mubr.msk.bf16.mxu0 %vm1129_vm0, %v1128_v0 }
 0x4ef   :  { %1075 = vmatprep.subr.bf16.mxu0 %v1128_v0 }
 0x4f2   :  { %1076 = vmatpush3.bf16.msra.mxu0 %v1222_v7 }
 0x4f3   :  { %1077 = vmatprep.subr.bf16.mxu0 %v1128_v0 }
 0x4f6   :  { %1078 = vmatpush3.bf16.msra.mxu0 %v1230_v8 }
 0x4f7   :  { %1079 = vmatprep.subr.bf16.mxu0 %v1128_v0 }
 0x4fa   :  { %1080 = vmatpush3.bf16.msra.mxu0 %v1237_v9 }
 0x4fb   :  { %1105 = vmatprep.subr.bf16.mxu0 %v1128_v0 }
 0x4fd   :  { %1082 = vmatmul.mubr.msk.bf16.vlgmr.msra.gmra.mrb[24].mxu0 %vm274_vm2, %v669_v39 }
 0x4fe   :  { %1106 = vmatpush3.bf16.msra.mxu0 %v1244_v18  ;;  %1109 = vmatprep.mubr.msk.bf16.mxu0 %vm1129_vm0, %v1128_v0 }
 0x4ff   :  { %1107 = vmatprep.subr.bf16.mxu0 %v1128_v0 }
 0x502   :  { %1108 = vmatpush3.bf16.msra.mxu0 %v1265_v45  ;;  %v760_v45 = vmax.f32 %v1259_v42, 0.0 }
 0x504   :  { %v761_v54 = vpack.c.bf16 %v760_v45, %v760_v45 }
 0x54b   :  { %v856_v5 = vpop.permute.xlu0 %855 }
 0x5c0   :  { %v660_v40 = vpop.f32.mrb[20].mxu0 }
 0x5c1   :  { %v661_v41 = vadd.f32 %v1319_v10, %v660_v40  ;;  %v1071_v43 = vpop.f32.mrb[21].mxu0 }
 0x5c2   :  { %v663_v44 = vpop.f32.mrb[22].mxu0 }
 0x5c3   :  { %859 = vrot.lane.b32.xlu1 %v661_v41, %s1133_s25  ;;  %v1072_v47 = vpop.f32.mrb[23].mxu0 }
 0x5d0   :  { %v707_v48 = vpop.f32.mrb[24].mxu0 }
 0x5d1   :  { %v708_v49 = vadd.f32 %v1274_v46, %v707_v48  ;;  %v1083_v50 = vpop.f32.mrb[25].mxu0 }
 0x5d2   :  { %v710_v18 = vpop.f32.mrb[26].mxu0 }
 0x5d3   :  { %v713_v51 = vmax.f32 %v708_v49, 0.0  ;;  %v1084_v52 = vpop.f32.mrb[27].mxu0 }
 0x5d5   :  { %v714_v53 = vpack.c.bf16 %v713_v51, %v713_v51 }
 0x5d7   :  { %1090 = vmatmul.mubr.msk.bf16.vlgmr.msra.gmra.mrb[24].mxu1 %vm338_vm3, %v714_v53 }
 0x5d8   :  { %1094 = vmatpush3.bf16.msra.mxu1 %v1216_v6  ;;  %1101 = vmatprep.mubr.msk.bf16.mxu1 %vm1129_vm0, %v1128_v0 }
 0x5d9   :  { %1095 = vmatprep.subr.bf16.mxu1 %v1128_v0 }
 0x5dc   :  { %1096 = vmatpush3.bf16.msra.mxu1 %v1222_v7 }
 0x5dd   :  { %1097 = vmatprep.subr.bf16.mxu1 %v1128_v0 }
 0x5e0   :  { %1098 = vmatpush3.bf16.msra.mxu1 %v1230_v8 }
 0x5e1   :  { %1099 = vmatprep.subr.bf16.mxu1 %v1128_v0 }
 0x5e4   :  { %1100 = vmatpush3.bf16.msra.mxu1 %v1237_v9 }
 0x5e7   :  { %1102 = vmatmul.mubr.msk.bf16.vlgmr.msra.gmra.mrb[28].mxu1 %vm274_vm2, %v761_v54 }
 0x635   :  { %v860_v11 = vpop.permute.xlu1 %859 }
 0x6aa   :  { %v752_v6 = vpop.f32.mrb[24].mxu1 }
 0x6ab   :  { %v753_v55 = vadd.f32 %v1319_v10, %v752_v6  ;;  %v1091_v57 = vpop.f32.mrb[25].mxu1 }
 0x6ac   :  { %v755_v58 = vpop.f32.mrb[26].mxu1 }
 0x6ad   :  { %863 = vrot.lane.b32.xlu0 %v753_v55, %s1134_s26  ;;  %v1092_v7 = vpop.f32.mrb[27].mxu1 }
 0x6ba   :  { %v799_v59 = vpop.f32.mrb[28].mxu1 }
 0x6bb   :  { %v800_v8 = vadd.f32 %v1274_v46, %v799_v59  ;;  %v1103_v60 = vpop.f32.mrb[29].mxu1  ;;  %v377_v46 = vadd.f32 %v1319_v10, %v1295_v56 }
 0x6bc   :  { %v802_v42 = vpop.f32.mrb[30].mxu1 }
 0x6bd   :  { %v805_v61 = vmax.f32 %v800_v8, 0.0  ;;  %v1104_v0 = vpop.f32.mrb[31].mxu1  ;;  %v871_v12 = vsel %vm870_vm4, %v377_v46, %v852_v4 }
 0x6be   :  { %v872_v14 = vsel %vm51_vm1, %v871_v12, %v856_v5 }
 0x6bf   :  { %v806_v62 = vpack.c.bf16 %v805_v61, %v805_v61  ;;  %v874_v15 = vsel %vm873_vm5, %v872_v14, %v860_v11 }
 0x6c1   :  { %1110 = vmatmul.mubr.msk.bf16.vlgmr.msra.gmra.mrb[28].mxu0 %vm338_vm3, %v806_v62 }
 0x71f   :  { %v864_v13 = vpop.permute.xlu0 %863 }
 0x720   :  { %v875_v16 = vsel %vm338_vm3, %v874_v15, %v864_v13 }
 0x794   :  { %v844_v9 = vpop.f32.mrb[28].mxu0 }
 0x795   :  { %v845_v63 = vadd.f32 %v1319_v10, %v844_v9  ;;  %v1111_v1 = vpop.f32.mrb[29].mxu0 }
 0x796   :  { %v847_v2 = vpop.f32.mrb[30].mxu0 }
 0x797   :  { %867 = vrot.lane.b32.xlu1 %v845_v63, %s1135_s27  ;;  %v1112_v3 = vpop.f32.mrb[31].mxu0 }
 0x809   :  { %v868_v17 = vpop.permute.xlu1 %867 }
 0x80a   :  { %v877_v19 = vsel %vm876_vm6, %v875_v16, %v868_v17 }
 0x80b   :  { %879 = vst.msk [vmem:[%s1394_s7] sm:$0x7] %vm878_vm7, %v877_v19 }

</bundles_post_ra>
